<compile_context>
chip_gen: v7x
topology: tpu7x:2x2x1
jax: 0.10.0
libtpu: 0.0.40
codegen_flags: <defaults>
</compile_context>

<pallas_src>
import functools

import jax
import jax.numpy as jnp
from jax.experimental import pallas as pl
from jax.experimental.pallas import tpu as pltpu

_LANE = 128


def _sublane_multiple(itemsize: int) -> int:
    # second-to-last block-dim multiple: f32 -> 8, bf16 -> 16, int8/fp8 -> 32
    return 8 * max(1, 4 // itemsize)


def _round_down(x: int, m: int) -> int:
    return (x // m) * m


def _round_up(x: int, m: int) -> int:
    return ((x + m - 1) // m) * m


def _is_pow2(n: int) -> bool:
    return n >= 1 and (n & (n - 1)) == 0


def _prev_pow2(n: int) -> int:
    return 1 << (max(1, n).bit_length() - 1)


def _device_tuning():
    """(target block bytes, vmem_limit cap) for the local TPU generation."""
    kind = ""
    try:
        kind = jax.devices()[0].device_kind.lower()
    except Exception:
        pass
    if "v7" in kind or "7x" in kind:
        # ~3.2 TB/s HBM: 0.35us/step is ~25-30% of a 2 MiB step -> 8 MiB blocks.
        # 2 operands x 2 buffers x 8 MiB = 32 MiB still fits the 64 MiB VMEM.
        return 8 << 20, 48 << 20
    if "v6" in kind:
        return 4 << 20, 64 << 20
    return 2 << 20, 48 << 20  # v5e / unknown


def _pick_rows(full: int, target: int, sub: int) -> int:
    """Row-tile <= target that is a multiple of `sub`, or the full dim."""
    t = min(full, max(1, target))
    if t >= full:
        return full
    if full >= sub:
        return max(sub, _round_down(t, sub))
    return full


# ----------------------------- kernel bodies --------------------------------


def _trilu_tiled_kernel(k_ref, x_ref, o_ref, *, upper: int):
    # x_ref / o_ref: (bt, tr, tc) VMEM tile.  k_ref: (1,) int32 in SMEM.
    k = k_ref[0]
    _, tr, tc = x_ref.shape
    row0 = pl.program_id(1) * tr
    col0 = pl.program_id(2) * tc
    if upper:
        # triu keeps c - r >= k; tile fully zeroed iff its max (c - r) < k.
        fully_zero = (col0 + (tc - 1)) - row0 < k
    else:
        # tril keeps c - r <= k; tile fully zeroed iff its min (c - r) > k.
        fully_zero = col0 - (row0 + (tr - 1)) > k

    @pl.when(fully_zero)
    def _():
        # The k-aware input index_map skipped this tile's HBM read, so x_ref
        # may hold a stale block -- never read it here, just write zeros.
        o_ref[...] = jnp.zeros_like(o_ref)

    @pl.when(jnp.logical_not(fully_zero))
    def _():
        # global: (col0 + cl) - (row0 + rl)  ?  k   <=>   (cl - rl)  ?  thresh
        thresh = k - col0 + row0
        rl = jax.lax.broadcasted_iota(jnp.int32, (tr, tc), 0)
        cl = jax.lax.broadcasted_iota(jnp.int32, (tr, tc), 1)
        d = cl - rl
        mask = (d >= thresh) if upper else (d <= thresh)
        x = x_ref[...]
        o_ref[...] = jnp.where(mask[None, :, :], x, jnp.zeros_like(x))


def _trilu_flat_kernel(k_ref, x_ref, o_ref, *, upper: int, r_pow: int, c_pow: int):
    # x_ref / o_ref: (tr, 128) lane-dense tile of the flattened (B*R*C) tensor.
    # R and C are powers of two, so row/col come from shifts/ands (no int div).
    k = k_ref[0]
    tr, lanes = x_ref.shape
    base = pl.program_id(0) * (tr * lanes)  # total < 2^31 guaranteed by wrapper
    rl = jax.lax.broadcasted_iota(jnp.int32, (tr, lanes), 0)
    cl = jax.lax.broadcasted_iota(jnp.int32, (tr, lanes), 1)
    flat = base + rl * lanes + cl
    col = flat & ((1 << c_pow) - 1)                # flat % C
    row = (flat >> c_pow) & ((1 << r_pow) - 1)     # (flat // C) % R
    d = col - row
    mask = (d >= k) if upper else (d <= k)
    x = x_ref[...]
    o_ref[...] = jnp.where(mask, x, jnp.zeros_like(x))


# --------------------------- index-map helpers -------------------------------


def _tiled_in_index_map(upper: int, tr: int, tc: int, nj: int):
    """k-aware input index_map.

    Tiles that are entirely on the zeroed side of the diagonal re-return the
    nearest needed tile's block index, so consecutive grid steps see the same
    index and Pallas skips the HBM->VMEM copy.  Only used when tc is a power of
    two (j_need is then a shift, no integer division in the scalar path).
    """
    if nj <= 1 or not _is_pow2(tc):
        return lambda b, i, j, k_ref: (b, i, j)
    shift = tc.bit_length() - 1
    if upper:
        def imap(b, i, j, k_ref):
            # smallest needed j:  j*tc + tc - 1 >= i*tr + k
            a = jnp.maximum(i * tr + k_ref[0], 0)
            j_need = jnp.minimum(a >> shift, nj - 1)
            return b, i, jnp.maximum(j, j_need)
    else:
        def imap(b, i, j, k_ref):
            # largest needed j:  j*tc <= i*tr + tr - 1 + k
            a = jnp.maximum(i * tr + (tr - 1) + k_ref[0], 0)
            j_need = jnp.minimum(a >> shift, nj - 1)
            return b, i, jnp.minimum(j, j_need)
    return imap


# ------------------------------- wrapper -------------------------------------


def onnx_trilu(x: jax.Array, k=None, *, upper: int = 0) -> jax.Array:
    """Pallas equivalent of OnnxTrilu.forward(x, k)."""
    orig_shape = x.shape
    assert x.ndim >= 2, "Trilu requires at least a 2-D input"
    R, C = int(orig_shape[-2]), int(orig_shape[-1])
    B = 1
    for d in orig_shape[:-2]:
        B *= int(d)
    total = B * R * C
    if total == 0:
        return x
    itemsize = jnp.dtype(x.dtype).itemsize
    sub = _sublane_multiple(itemsize)
    upper = int(upper)

    if k is None:
        k_arr = jnp.zeros((1,), jnp.int32)
    else:
        k_arr = jnp.asarray(k, jnp.int32).reshape((1,))

    target_bytes, vmem_cap = _device_tuning()
    cost = pl.CostEstimate(flops=total, transcendentals=0,
                           bytes_accessed=2 * total * itemsize)

    # ---------------- flat lane-dense path (small pow2 matrices) -------------
    use_flat = (C % _LANE != 0 and total % _LANE == 0
                and _is_pow2(C) and _is_pow2(R) and total < (1 << 31))
    if use_flat:
        nrows = total // _LANE
        slab_bytes = nrows * _LANE * itemsize
        # >= 2 grid steps for mid-sized slabs so v7x megacore uses both cores.
        eff_target = min(target_bytes, max(512 * 1024, slab_bytes // 2))
        tr = _pick_rows(nrows, eff_target // (_LANE * itemsize), sub)
        blk_bytes = tr * _LANE * itemsize
        x2 = x.reshape(nrows, _LANE)
        kernel = functools.partial(
            _trilu_flat_kernel, upper=upper,
            r_pow=R.bit_length() - 1, c_pow=C.bit_length() - 1)
        out = pl.pallas_call(
            kernel,
            out_shape=jax.ShapeDtypeStruct((nrows, _LANE), x.dtype),
            grid_spec=pltpu.PrefetchScalarGridSpec(
                num_scalar_prefetch=1,
                grid=(pl.cdiv(nrows, tr),),
                in_specs=[pl.BlockSpec((tr, _LANE), lambda i, kr: (i, 0))],
                out_specs=pl.BlockSpec((tr, _LANE), lambda i, kr: (i, 0)),
            ),
            compiler_params=pltpu.CompilerParams(
                dimension_semantics=("parallel",),
                vmem_limit_bytes=int(min(vmem_cap,
                                         max(32 << 20, 4 * blk_bytes + (8 << 20)))),
            ),
            cost_estimate=cost,
        )(k_arr, x2)
        return out.reshape(orig_shape)

    # ---------------- tiled (B, R, C) path ------------------------------------
    x3 = x.reshape(B, R, C)
    padded_c = _round_up(C, _LANE)
    padded_r = _round_up(R, sub)
    row_bytes = padded_c * itemsize            # one padded row in VMEM
    plane_bytes = padded_r * row_bytes         # one padded (R, C) plane in VMEM
    total_padded = B * plane_bytes
    # >= 2 grid steps for mid-sized tensors so v7x megacore uses both cores.
    eff_target = min(target_bytes, max(512 * 1024, total_padded // 2))
    # widest lane-aligned column tile that stays inside C
    c_cap = C if (C % _LANE == 0 or C < _LANE) else _round_down(C, _LANE)

    if plane_bytes > eff_target and c_cap >= 8 * _LANE:
        # Large matrices: 2-D (tr, tc) tiles, aspect roughly matched to the
        # plane so ni ~= nj; tc forced to a power of two so the k-aware DMA
        # skip index_map uses shifts only.
        ratio = (float(eff_target) / float(plane_bytes)) ** 0.5
        tc = _prev_pow2(min(max(4 * _LANE, int(padded_c * ratio)), c_cap))
        tr = _pick_rows(R, eff_target // (tc * itemsize), sub)
        # keep >= 2 row tiles when possible so the (parallel) i axis feeds both
        # v7x TensorCores and the diagonal skip has finer granularity.
        if R > sub:
            tr = min(tr, max(sub, _round_up((R + 1) // 2, sub)))
        bt = 1
    elif plane_bytes <= eff_target:
        # Small planes: whole (R, C) per block, pack the batch (padded budget).
        tr, tc = R, C
        bt = max(1, min(B, eff_target // plane_bytes))
    elif sub * row_bytes <= eff_target:
        # Full-C rows (one contiguous HBM region per row), tiled over R.
        tc = C
        tr = _pick_rows(R, eff_target // row_bytes, sub)
        bt = 1
    else:
        # Safety net: extremely wide rows.
        tr = min(R, sub)
        tc = max(_LANE, min(c_cap, _round_down(eff_target // (tr * itemsize), _LANE)))
        bt = 1

    blk_padded = bt * _round_up(tr, sub) * _round_up(tc, _LANE) * itemsize
    nb, ni, nj = pl.cdiv(B, bt), pl.cdiv(R, tr), pl.cdiv(C, tc)
    in_imap = _tiled_in_index_map(upper, tr, tc, nj)
    kernel = functools.partial(_trilu_tiled_kernel, upper=upper)

    # NOTE: callers that can donate x could also pass input_output_aliases
    # ({1: 0}, accounting for the scalar-prefetch arg) to drop the extra HBM
    # allocation; left off here since donation is caller-dependent.
    out3 = pl.pallas_call(
        kernel,
        out_shape=jax.ShapeDtypeStruct((B, R, C), x.dtype),
        grid_spec=pltpu.PrefetchScalarGridSpec(
            num_scalar_prefetch=1,
            grid=(nb, ni, nj),
            in_specs=[pl.BlockSpec((bt, tr, tc), in_imap)],
            out_specs=pl.BlockSpec((bt, tr, tc), lambda b, i, j, kr: (b, i, j)),
        ),
        compiler_params=pltpu.CompilerParams(
            # j stays sequential ("arbitrary") so the skip index_map compares
            # consecutive steps; b / i shard across v7x's two TensorCores.
            dimension_semantics=("parallel", "parallel", "arbitrary"),
            vmem_limit_bytes=int(min(vmem_cap,
                                     max(32 << 20, 4 * blk_padded + (8 << 20)))),
        ),
        cost_estimate=cost,
    )(k_arr, x3)
    return out3.reshape(orig_shape)


if __name__ == "__main__":
    key = jax.random.PRNGKey(0)

    # 1) Small-matrix case from the ONNX module (flat lane-dense path).
    x = jax.random.normal(key, (2, 4, 16, 16), dtype=jnp.float32)
    k1 = jnp.array(1, dtype=jnp.int32)
    out_tril = onnx_trilu(x, k1, upper=0)          # tril, diagonal k=1
    out_triu = onnx_trilu(x, None, upper=1)        # triu, default k=0

    # 2) Large lane-aligned matrix (2-D tiled path; exercises the k-aware
    #    DMA-skip and ragged row-edge tiles).
    xb = jax.random.normal(jax.random.PRNGKey(1), (1, 1024, 1536), dtype=jnp.float32)
    out_b_tril = onnx_trilu(xb, -3, upper=0)
    out_b_triu = onnx_trilu(xb, jnp.array(5, jnp.int32), upper=1)

    # 3) Mid-size matrix, non-1024 C (full-row tiling + >=2-step grid).
    xm = jax.random.normal(jax.random.PRNGKey(4), (1, 1200, 640), dtype=jnp.float32)
    out_m = onnx_trilu(xm, 0, upper=0)

    # 4) Odd, non-lane-aligned shape (batch-packed plane blocks, padded-VMEM
    #    budget).
    xo = jax.random.normal(jax.random.PRNGKey(2), (3, 5, 7), dtype=jnp.float32)
    out_o = onnx_trilu(xo, 0, upper=0)

    # 5) bf16 small matrices (flat path, sub-32-bit dtype).
    xh = jax.random.normal(jax.random.PRNGKey(3), (4, 16, 16)).astype(jnp.bfloat16)
    out_h = onnx_trilu(xh, -1, upper=1)

    jax.block_until_ready((out_tril, out_triu, out_b_tril, out_b_triu,
                           out_m, out_o, out_h))

    assert jnp.array_equal(out_tril, jnp.tril(x, k=1))
    assert jnp.array_equal(out_triu, jnp.triu(x, k=0))
    assert jnp.array_equal(out_b_tril, jnp.tril(xb, k=-3))
    assert jnp.array_equal(out_b_triu, jnp.triu(xb, k=5))
    assert jnp.array_equal(out_m, jnp.tril(xm, k=0))
    assert jnp.array_equal(out_o, jnp.tril(xo, k=0))
    assert jnp.array_equal(out_h, jnp.triu(xh, k=-1))

    print("KERNEL_OK")
</pallas_src>

<mosaic_0001>
module attributes {stable_mosaic.version = 11 : i64} {
  func.func @_trilu_flat_kernel(%arg0: i32, %arg1: memref<1xi32, #tpu.memory_space<smem>>, %arg2: memref<16x128xf32, #tpu.memory_space<vmem>>, %arg3: memref<16x128xf32, #tpu.memory_space<vmem>>) attributes {dimension_semantics = [#tpu.dimension_semantics<parallel>], iteration_bounds = array<i64: 1>, scalar_prefetch = 1 : i64, scratch_operands = 0 : i64, tpu.core_type = #tpu.core_type<tc>, window_params = [{transform_indices = @transform_0, window_bounds = array<i64: 16, 128>}, {transform_indices = @transform_1, window_bounds = array<i64: 16, 128>}]} {
    %c0 = arith.constant 0 : index
    %0 = memref.load %arg1[%c0] : memref<1xi32, #tpu.memory_space<smem>>
    %c2048_i32 = arith.constant 2048 : i32
    %1 = arith.muli %arg0, %c2048_i32 : i32
    %2 = tpu.iota {dimensions = array<i32: 0>} : vector<16x128xi32>
    %3 = tpu.iota {dimensions = array<i32: 1>} : vector<16x128xi32>
    %c128_i32 = arith.constant 128 : i32
    %4 = vector.broadcast %c128_i32 : i32 to vector<16x128xi32>
    %5 = arith.muli %2, %4 : vector<16x128xi32>
    %6 = vector.broadcast %1 : i32 to vector<16x128xi32>
    %7 = arith.addi %6, %5 : vector<16x128xi32>
    %8 = arith.addi %7, %3 : vector<16x128xi32>
    %c15_i32 = arith.constant 15 : i32
    %9 = vector.broadcast %c15_i32 : i32 to vector<16x128xi32>
    %10 = arith.andi %8, %9 : vector<16x128xi32>
    %c4_i32 = arith.constant 4 : i32
    %11 = vector.broadcast %c4_i32 : i32 to vector<16x128xi32>
    %12 = arith.shrsi %8, %11 : vector<16x128xi32>
    %c15_i32_0 = arith.constant 15 : i32
    %13 = vector.broadcast %c15_i32_0 : i32 to vector<16x128xi32>
    %14 = arith.andi %12, %13 : vector<16x128xi32>
    %15 = arith.subi %10, %14 : vector<16x128xi32>
    %16 = vector.broadcast %0 : i32 to vector<16x128xi32>
    %17 = arith.cmpi sle, %15, %16 : vector<16x128xi32>
    %c0_1 = arith.constant 0 : index
    %c0_2 = arith.constant 0 : index
    %18 = vector.load %arg2[%c0_1, %c0_2] : memref<16x128xf32, #tpu.memory_space<vmem>>, vector<16x128xf32>
    %cst = arith.constant 0.000000e+00 : f32
    %19 = vector.broadcast %cst : f32 to vector<16x128xf32>
    %20 = arith.select %17, %18, %19 : vector<16x128xi1>, vector<16x128xf32>
    %c0_3 = arith.constant 0 : index
    %c0_4 = arith.constant 0 : index
    %21 = vector.load %arg3[%c0_3, %c0_4] : memref<16x128xf32, #tpu.memory_space<vmem>>, vector<16x128xf32>
    tpu.vector_store %arg3[%c0_3, %c0_4], %20 {strides = array<i32>} : memref<16x128xf32, #tpu.memory_space<vmem>>, vector<16x128xf32>,
    return
  }
  func.func @transform_0(%arg0: i32, %arg1: memref<1xi32, #tpu.memory_space<smem>>) -> (i32, i32) {
    %c0_i32 = arith.constant 0 : i32
    %c0_i32_0 = arith.constant 0 : i32
    return %arg0, %c0_i32 : i32, i32
  }
  func.func @transform_1(%arg0: i32, %arg1: memref<1xi32, #tpu.memory_space<smem>>) -> (i32, i32) {
    %c0_i32 = arith.constant 0 : i32
    %c0_i32_0 = arith.constant 0 : i32
    return %arg0, %c0_i32 : i32, i32
  }
}

</mosaic_0001>

<bundles_post_ra>
// kernel: tpu_custom_call.1
= control target key start
LH: loop header
LB: loop body
LE: loop exit
PB: predicated region body
PF: predicated region fallthrough
CT: control target
= control target key end

     0   :  { %8 = vsyncpa [#allocation5], 0  ;;  %s177_s0 = inlined_call_operand.<no memory space> [shape: s32[1], index: 0, kind: input, shape index: {}]   ;;  %s178_s1 = inlined_call_operand.hbm [shape: f32[16,128], index: 1, kind: input, shape index: {}]   ;;  %s179_s2 = inlined_call_operand.hbm [shape: f32[16,128], index: 2, kind: output, shape index: {}]  }
   0x1   :  { %9 = vsyncpa [#allocation6], 0  ;;  %s125_s9 = smov [#allocation4]   ;;  %s77_s13 = scalar_lea.hbm %s178_s1, 256 }
   0x2   :  { %s15_s10 = sshll.u32 %s125_s9, 4  ;;  %p78_p0 = scmp.ne.s32.totalorder %s178_s1, %s77_s13  ;;  %s16_s10 = int_to_ptr.vmem [resolvable:$true] %s15_s10 }
   0x3   :  { %p81_p1 = scmp.lt.u32.totalorder %s77_s13, %s178_s1 }
   0x5   :  { %p83_p2 = pnand %p81_p1, %p78_p0 }
   0x7   :  { %86 = shalt.err (!%p83_p2)
}
   0x8   :  { %s87_s18 = scalar_lea.vmem %s16_s10, 256  ;;  %p92_p4 = scmp.lt.s32.totalorder %s16_s10, %s16_s10 }
   0x9   :  { %p88_p3 = scmp.ne.s32.totalorder %s16_s10, %s87_s18  ;;  %p93_p5 = scmp.lt.s32.totalorder %s87_s18, %s87_s18 }
   0xb   :  { %p94_p6 = por %p93_p5, %p92_p4 }
   0xd   :  { %p95_p7 = pnand %p94_p6, %p88_p3 }
   0xf   :  { %98 = shalt.err (!%p95_p7)
}
  0x10   :  { %s126_s19 = smov 128   ;;  %s127_s20 = smov 8  }
  0x11   :  { %21 = dma.hbm_to_vmem [thread:$0]  %s178_s1, 256, %s16_s10, [#allocation5], %s126_s19, %s126_s19, %s127_s20  }
  0x12   :  { %121 = dma.done.wait [#allocation5], 256  }
  0x13   :  { %122 = vsyncadd [#allocation5], 4294967040  ;;  %v27_v0 = vlaneseq  ;;  %v47_v13 = vstv %s177_s0  ;;  %v50_v15 = vld [vmem:[#allocation4] sm:$0xff]  ;;  %s128_s1 = smov [#allocation7]   ;;  %v51_v18 = vld [vmem:[#allocation4 + $0x8] sm:$0xff] }
  0x14   :  { %s61_s25 = sshll.u32 %s128_s1, 4  ;;  %s62_s25 = int_to_ptr.vmem [resolvable:$true] %s61_s25 }
  0x15   :  { %v28_v1 = vshrl.u32 %v27_v0, 7  ;;  %v31_v2 = vand.u32 127, %v27_v0  ;;  %s99_s26 = scalar_lea.vmem %s62_s25, 256  ;;  %p104_p9 = scmp.lt.s32.totalorder %s62_s25, %s62_s25 }
  0x16   :  { %p100_p8 = scmp.ne.s32.totalorder %s62_s25, %s99_s26  ;;  %p105_p10 = scmp.lt.s32.totalorder %s99_s26, %s99_s26 }
  0x17   :  { %v32_v3 = vmul.u32 128, %v28_v1  ;;  %v29_v4 = vadd.s32 8, %v28_v1 }
  0x18   :  { %p106_p11 = por %p105_p10, %p104_p9 }
  0x19   :  { %v37_v5 = vadd.s32 %v32_v3, %v31_v2  ;;  %v33_v6 = vmul.u32 128, %v29_v4 }
  0x1a   :  { %p107_p12 = pnand %p106_p11, %p100_p8 }
  0x1b   :  { %v39_v7 = vand.u32 15, %v37_v5  ;;  %v41_v8 = vshra.s32 %v37_v5, 4  ;;  %v38_v9 = vadd.s32 %v33_v6, %v31_v2 }
  0x1d   :  { %v43_v10 = vand.u32 15, %v41_v8  ;;  %v40_v11 = vand.u32 15, %v38_v9  ;;  %v42_v12 = vshra.s32 %v38_v9, 4 }
  0x1f   :  { %v45_v14 = vsub.s32 %v39_v7, %v43_v10  ;;  %v44_v16 = vand.u32 15, %v42_v12 }
  0x21   :  { %vm48_vm0 = vcmp.le.s32.totalorder %v45_v14, %v47_v13  ;;  %v46_v17 = vsub.s32 %v40_v11, %v44_v16 }
  0x22   :  { %v52_v19 = vsel %vm48_vm0, %v50_v15, 0.0 }
  0x23   :  { %54 = vst [vmem:[#allocation7] sm:$0xff] %v52_v19  ;;  %vm49_vm1 = vcmp.le.s32.totalorder %v46_v17, %v47_v13 }
  0x24   :  { %v53_v20 = vsel %vm49_vm1, %v51_v18, 0.0 }
  0x25   :  { %55 = vst [vmem:[#allocation7 + $0x8] sm:$0xff] %v53_v20 }
  0x26   :  { %110 = shalt.err (!%p107_p12)
}
  0x27   :  { %s111_s28 = scalar_lea.hbm %s179_s2, 256 }
  0x28   :  { %p112_p13 = scmp.ne.s32.totalorder %s179_s2, %s111_s28  ;;  %p115_p0 = scmp.lt.u32.totalorder %s111_s28, %s179_s2 }
  0x2a   :  { %p117_p1 = pnand %p115_p0, %p112_p13 }
  0x2c   :  { %120 = shalt.err (!%p117_p1)
}
  0x2d   :  { %67 = dma.vmem_to_hbm [thread:$0]  %s62_s25, 256, %s179_s2, [#allocation6], %s126_s19, %s126_s19, %s127_s20  }
  0x2e   :  { %123 = dma.done.wait [#allocation6], 256  }
  0x2f   :  { %124 = vsyncadd [#allocation6], 4294967040 }
  0x30   :  { %71 = vsyncpa [#allocation5], 1 }
  0x31   :  { %72 = vsyncpa [#allocation6], 1 }

</bundles_post_ra>
